<compile_context>
chip_gen: v7x
topology: tpu7x:2x2x1
jax: 0.10.0
libtpu: 0.0.40
codegen_flags: <defaults>
</compile_context>

<pallas_src>
import functools

import jax
import jax.numpy as jnp
from jax.experimental import pallas as pl
from jax.experimental.pallas import tpu as pltpu


def attention_kernel(x_ref, gamma_ref, beta_ref, wqkv_ref, wout_ref, bout_ref,
                     o_ref, out_sc, *, heads, dim_head, q_tile):
    Bt, N, D = x_ref.shape
    inner = heads * dim_head
    M = Bt * N

    # ---- LayerNorm in f32 (eps = 1e-5, PyTorch default); x arrives as bf16 ----
    x = x_ref[...].astype(jnp.float32).reshape(M, D)
    mean = jnp.mean(x, axis=-1, keepdims=True)
    var = jnp.mean((x - mean) ** 2, axis=-1, keepdims=True)
    xn = (x - mean) * jax.lax.rsqrt(var + 1e-5)
    xn = xn * gamma_ref[0].astype(jnp.float32) + beta_ref[0].astype(jnp.float32)

    # ---- fused q/k/v projection: ONE wide matmul, bf16 operands, f32 acc ----
    # (softmax scale is pre-folded into the q columns of wqkv in the wrapper)
    qkv = jnp.dot(xn.astype(jnp.bfloat16), wqkv_ref[...],
                  preferred_element_type=jnp.float32)            # (M, 3*inner)
    qkv = qkv.astype(jnp.bfloat16)

    # ---- per-(batch-row, head) attention core, q-tiled ----
    # TODO(synk): pack 2-4 heads along the lane dim for the PV matmul so its
    # output width fills the 256-wide v6e/v7x MXU (dh=16..64 fills <=25%).
    num_qt = N // q_tile
    for b in range(Bt):
        r0 = b * N
        for h in range(heads):
            c = h * dim_head
            k_h = qkv[r0:r0 + N, inner + c:inner + c + dim_head]           # (N, dh)
            v_h = qkv[r0:r0 + N, 2 * inner + c:2 * inner + c + dim_head]   # (N, dh)
            for t in range(num_qt):
                r = r0 + t * q_tile
                q_t = qkv[r:r + q_tile, c:c + dim_head]                    # (tq, dh)
                # q @ k^T as a last-dim contraction (no explicit k transpose)
                dots = jax.lax.dot_general(
                    q_t, k_h, (((1,), (1,)), ((), ())),
                    preferred_element_type=jnp.float32)                    # (tq, N) f32
                # fused max-subtract + exp: only one (tq, N) f32 score buffer
                p = jnp.exp(dots - jnp.max(dots, axis=-1, keepdims=True))
                attn = p / jnp.sum(p, axis=-1, keepdims=True)              # exact divide
                # dropout(p=0.0) is an identity.
                out_t = jnp.dot(attn.astype(jnp.bfloat16), v_h,
                                preferred_element_type=jnp.float32)        # (tq, dh)
                # merge heads by writing each head's lane slice of the scratch
                out_sc[r:r + q_tile, c:c + dim_head] = out_t.astype(jnp.bfloat16)

    # ---- output projection: ONE merged matmul (M, inner) @ (inner, D) ----
    proj = jnp.dot(out_sc[...], wout_ref[...],
                   preferred_element_type=jnp.float32)                     # (M, D)
    proj = proj + bout_ref[0].astype(jnp.float32)
    o_ref[...] = proj.reshape(Bt, N, D).astype(o_ref.dtype)


def attention_forward(x, gamma, beta, wqkv, wout, bout, *, heads, dim_head,
                      batch_tile=None, q_tile=None, vmem_limit_bytes=None):
    B, N, D = x.shape
    inner = heads * dim_head
    assert wqkv.shape == (D, 3 * inner) and wout.shape == (inner, D)

    if batch_tile is None:
        # tiny problems: one fat grid step; big problems: one batch row / step
        batch_tile = B if B * N * D <= (1 << 20) else 1
    assert B % batch_tile == 0
    if q_tile is None:
        # keep score/prob tiles (q_tile, N) small at real ViT sizes
        # (mandatory for v7x's 64 MiB VMEM); toy sizes use a single tile.
        q_tile = 128 if (N > 256 and N % 128 == 0) else N
    assert N % q_tile == 0

    scale = dim_head ** -0.5
    # One-time wrapper-side prep (plain XLA): fold the softmax scale into the
    # q columns of the fused qkv weight; weights + activations to bf16.
    col_scale = jnp.concatenate([jnp.full((inner,), scale, jnp.float32),
                                 jnp.ones((2 * inner,), jnp.float32)])
    wqkv_b = (wqkv.astype(jnp.float32) * col_scale[None, :]).astype(jnp.bfloat16)
    wout_b = wout.astype(jnp.bfloat16)
    x_b = x.astype(jnp.bfloat16)
    gamma32 = gamma.astype(jnp.float32)
    beta32 = beta.astype(jnp.float32)
    bout32 = bout.astype(jnp.float32)

    # Advisory cost estimate so XLA schedules around the custom call sensibly.
    flops = (2 * B * N * D * 3 * inner            # qkv projection
             + 4 * B * heads * N * N * dim_head   # QK^T + PV
             + 2 * B * N * inner * D)             # output projection
    bytes_accessed = (x_b.size * 2 + B * N * D * x.dtype.itemsize
                      + wqkv_b.size * 2 + wout_b.size * 2 + 3 * D * 4)
    cost = pl.CostEstimate(flops=flops, transcendentals=B * heads * N * N,
                           bytes_accessed=bytes_accessed)

    if vmem_limit_bytes is None:
        M = batch_tile * N
        est = (2 * M * D * (2 + x.dtype.itemsize)    # double-buffered x/o tiles
               + wqkv_b.size * 2 + wout_b.size * 2   # resident weights
               + M * D * 6                           # xn (f32 + bf16)
               + M * 3 * inner * 6                   # qkv (f32 acc + bf16)
               + M * inner * 2                       # head-merge scratch
               + 4 * q_tile * N * 4)                 # score / prob tiles
        # ~30% headroom, capped to stay inside v7x's 64 MiB physical VMEM.
        vmem_limit_bytes = max(32 << 20, min(int(est * 1.3), 64 << 20))

    kernel = functools.partial(attention_kernel, heads=heads,
                               dim_head=dim_head, q_tile=q_tile)
    return pl.pallas_call(
        kernel,
        out_shape=jax.ShapeDtypeStruct((B, N, D), x.dtype),
        grid=(B // batch_tile,),
        in_specs=[
            pl.BlockSpec((batch_tile, N, D), lambda b: (b, 0, 0)),   # x (bf16)
            pl.BlockSpec((1, D), lambda b: (0, 0)),                  # LN gamma
            pl.BlockSpec((1, D), lambda b: (0, 0)),                  # LN beta
            pl.BlockSpec((D, 3 * inner), lambda b: (0, 0)),          # W_qkv (scaled)
            pl.BlockSpec((inner, D), lambda b: (0, 0)),              # W_out
            pl.BlockSpec((1, D), lambda b: (0, 0)),                  # b_out
        ],
        out_specs=pl.BlockSpec((batch_tile, N, D), lambda b: (b, 0, 0)),
        scratch_shapes=[pltpu.VMEM((batch_tile * N, inner), jnp.bfloat16)],
        compiler_params=pltpu.CompilerParams(
            dimension_semantics=("parallel",),
            vmem_limit_bytes=vmem_limit_bytes),
        cost_estimate=cost,
    )(x_b, gamma32, beta32, wqkv_b, wout_b, bout32)


def reference_forward(x, gamma, beta, wqkv, wout, bout, *, heads, dim_head):
    # Pure-JAX f32 reference matching the PyTorch module semantics.
    xf = x.astype(jnp.float32)
    mean = jnp.mean(xf, axis=-1, keepdims=True)
    var = jnp.mean((xf - mean) ** 2, axis=-1, keepdims=True)
    xn = (xf - mean) * jax.lax.rsqrt(var + 1e-5) * gamma[0] + beta[0]
    qkv = xn @ wqkv
    inner = heads * dim_head
    q, k, v = qkv[..., :inner], qkv[..., inner:2 * inner], qkv[..., 2 * inner:]
    B, N, _ = x.shape

    def split(t):  # b n (h d) -> b h n d
        return t.reshape(B, N, heads, dim_head).transpose(0, 2, 1, 3)

    q, k, v = split(q), split(k), split(v)
    dots = jnp.einsum('bhnd,bhmd->bhnm', q, k) * (dim_head ** -0.5)
    attn = jax.nn.softmax(dots, axis=-1)
    out = jnp.einsum('bhnm,bhmd->bhnd', attn, v)
    out = out.transpose(0, 2, 1, 3).reshape(B, N, inner)
    return (out @ wout + bout[0]).astype(x.dtype)


if __name__ == "__main__":
    B, N, dim = 2, 8, 32
    heads, dim_head = 4, 16
    inner = heads * dim_head

    key = jax.random.PRNGKey(0)
    kx, kq, ko, kb = jax.random.split(key, 4)

    x = jax.random.normal(kx, (B, N, dim), dtype=jnp.float32)
    gamma = jnp.ones((1, dim), dtype=jnp.float32)        # LayerNorm weight
    beta = jnp.zeros((1, dim), dtype=jnp.float32)        # LayerNorm bias
    # Synthetic deterministic weights (stored as (in, out) so kernel does x @ W).
    wqkv = jax.random.normal(kq, (dim, 3 * inner), dtype=jnp.float32) * 0.05
    wout = jax.random.normal(ko, (inner, dim), dtype=jnp.float32) * 0.05
    bout = jax.random.normal(kb, (1, dim), dtype=jnp.float32) * 0.05

    out = attention_forward(x, gamma, beta, wqkv, wout, bout,
                            heads=heads, dim_head=dim_head)
    out = jax.block_until_ready(out)

    ref = reference_forward(x, gamma, beta, wqkv, wout, bout,
                            heads=heads, dim_head=dim_head)
    assert out.shape == (B, N, dim)
    # bf16 MXU operands / bf16 x DMA (f32 accumulation, f32 LN stats) =>
    # loosened tolerance vs the pure-f32 reference.
    err = float(jnp.max(jnp.abs(out - ref)))
    assert jnp.allclose(out, ref, atol=2e-2, rtol=2e-2), err

    print("KERNEL_OK")
</pallas_src>

<mosaic_0001>
module attributes {stable_mosaic.version = 11 : i64} {
  func.func @attention_kernel(%arg0: i32, %arg1: memref<2x8x32xbf16, #tpu.memory_space<vmem>>, %arg2: memref<1x32xf32, #tpu.memory_space<vmem>>, %arg3: memref<1x32xf32, #tpu.memory_space<vmem>>, %arg4: memref<32x192xbf16, #tpu.memory_space<vmem>>, %arg5: memref<64x32xbf16, #tpu.memory_space<vmem>>, %arg6: memref<1x32xf32, #tpu.memory_space<vmem>>, %arg7: memref<2x8x32xf32, #tpu.memory_space<vmem>>, %arg8: memref<16x64xbf16, #tpu.memory_space<vmem>>) attributes {dimension_semantics = [#tpu.dimension_semantics<parallel>], iteration_bounds = array<i64: 1>, scalar_prefetch = 0 : i64, scratch_operands = 1 : i64, tpu.core_type = #tpu.core_type<tc>, window_params = [{transform_indices = @transform_0, window_bounds = array<i64: 2, 8, 32>}, {pipeline_mode = #tpu.pipeline_mode<synchronous>, transform_indices = @transform_1, window_bounds = array<i64: 1, 32>}, {pipeline_mode = #tpu.pipeline_mode<synchronous>, transform_indices = @transform_2, window_bounds = array<i64: 1, 32>}, {pipeline_mode = #tpu.pipeline_mode<synchronous>, transform_indices = @transform_3, window_bounds = array<i64: 32, 192>}, {pipeline_mode = #tpu.pipeline_mode<synchronous>, transform_indices = @transform_4, window_bounds = array<i64: 64, 32>}, {pipeline_mode = #tpu.pipeline_mode<synchronous>, transform_indices = @transform_5, window_bounds = array<i64: 1, 32>}, {transform_indices = @transform_6, window_bounds = array<i64: 2, 8, 32>}]} {
    %c0 = arith.constant 0 : index
    %c0_0 = arith.constant 0 : index
    %c0_1 = arith.constant 0 : index
    %0 = vector.load %arg1[%c0, %c0_0, %c0_1] : memref<2x8x32xbf16, #tpu.memory_space<vmem>>, vector<2x8x32xbf16>
    %1 = arith.extf %0 : vector<2x8x32xbf16> to vector<2x8x32xf32>
    %2 = vector.shape_cast %1 : vector<2x8x32xf32> to vector<16x32xf32>
    %cst = arith.constant dense<0.000000e+00> : vector<16xf32>
    %3 = vector.multi_reduction <add>, %2, %cst [1] : vector<16x32xf32> to vector<16xf32>
    %4 = vector.shape_cast %3 : vector<16xf32> to vector<16x1xf32>
    %cst_2 = arith.constant 3.200000e+01 : f32
    %5 = vector.broadcast %cst_2 : f32 to vector<16x1xf32>
    %6 = arith.divf %4, %5 : vector<16x1xf32>
    %7 = vector.broadcast %6 : vector<16x1xf32> to vector<16x32xf32>
    %8 = arith.subf %2, %7 : vector<16x32xf32>
    %9 = arith.mulf %8, %8 : vector<16x32xf32>
    %cst_3 = arith.constant dense<0.000000e+00> : vector<16xf32>
    %10 = vector.multi_reduction <add>, %9, %cst_3 [1] : vector<16x32xf32> to vector<16xf32>
    %11 = vector.shape_cast %10 : vector<16xf32> to vector<16x1xf32>
    %cst_4 = arith.constant 3.200000e+01 : f32
    %12 = vector.broadcast %cst_4 : f32 to vector<16x1xf32>
    %13 = arith.divf %11, %12 : vector<16x1xf32>
    %14 = vector.broadcast %6 : vector<16x1xf32> to vector<16x32xf32>
    %15 = arith.subf %2, %14 : vector<16x32xf32>
    %cst_5 = arith.constant 9.99999974E-6 : f32
    %16 = vector.broadcast %cst_5 : f32 to vector<16x1xf32>
    %17 = arith.addf %13, %16 : vector<16x1xf32>
    %18 = math.rsqrt %17 : vector<16x1xf32>
    %19 = vector.broadcast %18 : vector<16x1xf32> to vector<16x32xf32>
    %20 = arith.mulf %15, %19 : vector<16x32xf32>
    %c0_6 = arith.constant 0 : index
    %c0_7 = arith.constant 0 : index
    %21 = vector.load %arg2[%c0_6, %c0_7] : memref<1x32xf32, #tpu.memory_space<vmem>>, vector<1x32xf32>
    %22 = vector.shape_cast %21 : vector<1x32xf32> to vector<32xf32>
    %23 = vector.shape_cast %22 : vector<32xf32> to vector<1x32xf32>
    %24 = vector.broadcast %23 : vector<1x32xf32> to vector<16x32xf32>
    %25 = arith.mulf %20, %24 : vector<16x32xf32>
    %c0_8 = arith.constant 0 : index
    %c0_9 = arith.constant 0 : index
    %26 = vector.load %arg3[%c0_8, %c0_9] : memref<1x32xf32, #tpu.memory_space<vmem>>, vector<1x32xf32>
    %27 = vector.shape_cast %26 : vector<1x32xf32> to vector<32xf32>
    %28 = vector.shape_cast %27 : vector<32xf32> to vector<1x32xf32>
    %29 = vector.broadcast %28 : vector<1x32xf32> to vector<16x32xf32>
    %30 = arith.addf %25, %29 : vector<16x32xf32>
    %31 = arith.truncf %30 : vector<16x32xf32> to vector<16x32xbf16>
    %c0_10 = arith.constant 0 : index
    %c0_11 = arith.constant 0 : index
    %32 = vector.load %arg4[%c0_10, %c0_11] : memref<32x192xbf16, #tpu.memory_space<vmem>>, vector<32x192xbf16>
    %cst_12 = arith.constant dense<0.000000e+00> : vector<16x192xf32>
    %33 = tpu.matmul %31, %32, %cst_12 {dimension_numbers = #tpu.dot_dimension_numbers<[1], [0], [0], [1], [0, 0, 1, 1], [], []>} : vector<16x32xbf16>, vector<32x192xbf16>, vector<16x192xf32> -> vector<16x192xf32>
    %34 = arith.truncf %33 : vector<16x192xf32> to vector<16x192xbf16>
    %35 = vector.extract_strided_slice %34 {offsets = [0, 64], sizes = [8, 16], strides = [1, 1]} : vector<16x192xbf16> to vector<8x16xbf16>
    %36 = vector.extract_strided_slice %34 {offsets = [0, 128], sizes = [8, 16], strides = [1, 1]} : vector<16x192xbf16> to vector<8x16xbf16>
    %37 = vector.extract_strided_slice %34 {offsets = [0, 0], sizes = [8, 16], strides = [1, 1]} : vector<16x192xbf16> to vector<8x16xbf16>
    %cst_13 = arith.constant dense<0.000000e+00> : vector<8x8xf32>
    %38 = tpu.matmul %37, %35, %cst_13 {dimension_numbers = #tpu.dot_dimension_numbers<[1], [1], [0], [0], [0, 0, 1, 0], [], []>} : vector<8x16xbf16>, vector<8x16xbf16>, vector<8x8xf32> -> vector<8x8xf32>
    %cst_14 = arith.constant dense<0xFF800000> : vector<8xf32>
    %39 = vector.multi_reduction <maximumf>, %38, %cst_14 [1] : vector<8x8xf32> to vector<8xf32>
    %40 = vector.shape_cast %39 : vector<8xf32> to vector<8x1xf32>
    %41 = vector.broadcast %40 : vector<8x1xf32> to vector<8x8xf32>
    %42 = arith.subf %38, %41 : vector<8x8xf32>
    %43 = math.exp %42 : vector<8x8xf32>
    %cst_15 = arith.constant dense<0.000000e+00> : vector<8xf32>
    %44 = vector.multi_reduction <add>, %43, %cst_15 [1] : vector<8x8xf32> to vector<8xf32>
    %45 = vector.shape_cast %44 : vector<8xf32> to vector<8x1xf32>
    %46 = vector.broadcast %45 : vector<8x1xf32> to vector<8x8xf32>
    %47 = arith.divf %43, %46 : vector<8x8xf32>
    %48 = arith.truncf %47 : vector<8x8xf32> to vector<8x8xbf16>
    %cst_16 = arith.constant dense<0.000000e+00> : vector<8x16xf32>
    %49 = tpu.matmul %48, %36, %cst_16 {dimension_numbers = #tpu.dot_dimension_numbers<[1], [0], [0], [1], [0, 0, 1, 1], [], []>} : vector<8x8xbf16>, vector<8x16xbf16>, vector<8x16xf32> -> vector<8x16xf32>
    %50 = arith.truncf %49 : vector<8x16xf32> to vector<8x16xbf16>
    %c0_17 = arith.constant 0 : index
    %c0_18 = arith.constant 0 : index
    %51 = vector.load %arg8[%c0_17, %c0_18] : memref<16x64xbf16, #tpu.memory_space<vmem>>, vector<8x16xbf16>
    tpu.vector_store %arg8[%c0_17, %c0_18], %50 {strides = array<i32>} : memref<16x64xbf16, #tpu.memory_space<vmem>>, vector<8x16xbf16>,
    %52 = vector.extract_strided_slice %34 {offsets = [0, 80], sizes = [8, 16], strides = [1, 1]} : vector<16x192xbf16> to vector<8x16xbf16>
    %53 = vector.extract_strided_slice %34 {offsets = [0, 144], sizes = [8, 16], strides = [1, 1]} : vector<16x192xbf16> to vector<8x16xbf16>
    %54 = vector.extract_strided_slice %34 {offsets = [0, 16], sizes = [8, 16], strides = [1, 1]} : vector<16x192xbf16> to vector<8x16xbf16>
    %cst_19 = arith.constant dense<0.000000e+00> : vector<8x8xf32>
    %55 = tpu.matmul %54, %52, %cst_19 {dimension_numbers = #tpu.dot_dimension_numbers<[1], [1], [0], [0], [0, 0, 1, 0], [], []>} : vector<8x16xbf16>, vector<8x16xbf16>, vector<8x8xf32> -> vector<8x8xf32>
    %cst_20 = arith.constant dense<0xFF800000> : vector<8xf32>
    %56 = vector.multi_reduction <maximumf>, %55, %cst_20 [1] : vector<8x8xf32> to vector<8xf32>
    %57 = vector.shape_cast %56 : vector<8xf32> to vector<8x1xf32>
    %58 = vector.broadcast %57 : vector<8x1xf32> to vector<8x8xf32>
    %59 = arith.subf %55, %58 : vector<8x8xf32>
    %60 = math.exp %59 : vector<8x8xf32>
    %cst_21 = arith.constant dense<0.000000e+00> : vector<8xf32>
    %61 = vector.multi_reduction <add>, %60, %cst_21 [1] : vector<8x8xf32> to vector<8xf32>
    %62 = vector.shape_cast %61 : vector<8xf32> to vector<8x1xf32>
    %63 = vector.broadcast %62 : vector<8x1xf32> to vector<8x8xf32>
    %64 = arith.divf %60, %63 : vector<8x8xf32>
    %65 = arith.truncf %64 : vector<8x8xf32> to vector<8x8xbf16>
    %cst_22 = arith.constant dense<0.000000e+00> : vector<8x16xf32>
    %66 = tpu.matmul %65, %53, %cst_22 {dimension_numbers = #tpu.dot_dimension_numbers<[1], [0], [0], [1], [0, 0, 1, 1], [], []>} : vector<8x8xbf16>, vector<8x16xbf16>, vector<8x16xf32> -> vector<8x16xf32>
    %67 = arith.truncf %66 : vector<8x16xf32> to vector<8x16xbf16>
    %c0_23 = arith.constant 0 : index
    %c16 = arith.constant 16 : index
    %68 = vector.load %arg8[%c0_23, %c16] : memref<16x64xbf16, #tpu.memory_space<vmem>>, vector<8x16xbf16>
    tpu.vector_store %arg8[%c0_23, %c16], %67 {strides = array<i32>} : memref<16x64xbf16, #tpu.memory_space<vmem>>, vector<8x16xbf16>,
    %69 = vector.extract_strided_slice %34 {offsets = [0, 96], sizes = [8, 16], strides = [1, 1]} : vector<16x192xbf16> to vector<8x16xbf16>
    %70 = vector.extract_strided_slice %34 {offsets = [0, 160], sizes = [8, 16], strides = [1, 1]} : vector<16x192xbf16> to vector<8x16xbf16>
    %71 = vector.extract_strided_slice %34 {offsets = [0, 32], sizes = [8, 16], strides = [1, 1]} : vector<16x192xbf16> to vector<8x16xbf16>
    %cst_24 = arith.constant dense<0.000000e+00> : vector<8x8xf32>
    %72 = tpu.matmul %71, %69, %cst_24 {dimension_numbers = #tpu.dot_dimension_numbers<[1], [1], [0], [0], [0, 0, 1, 0], [], []>} : vector<8x16xbf16>, vector<8x16xbf16>, vector<8x8xf32> -> vector<8x8xf32>
    %cst_25 = arith.constant dense<0xFF800000> : vector<8xf32>
    %73 = vector.multi_reduction <maximumf>, %72, %cst_25 [1] : vector<8x8xf32> to vector<8xf32>
    %74 = vector.shape_cast %73 : vector<8xf32> to vector<8x1xf32>
    %75 = vector.broadcast %74 : vector<8x1xf32> to vector<8x8xf32>
    %76 = arith.subf %72, %75 : vector<8x8xf32>
    %77 = math.exp %76 : vector<8x8xf32>
    %cst_26 = arith.constant dense<0.000000e+00> : vector<8xf32>
    %78 = vector.multi_reduction <add>, %77, %cst_26 [1] : vector<8x8xf32> to vector<8xf32>
    %79 = vector.shape_cast %78 : vector<8xf32> to vector<8x1xf32>
    %80 = vector.broadcast %79 : vector<8x1xf32> to vector<8x8xf32>
    %81 = arith.divf %77, %80 : vector<8x8xf32>
    %82 = arith.truncf %81 : vector<8x8xf32> to vector<8x8xbf16>
    %cst_27 = arith.constant dense<0.000000e+00> : vector<8x16xf32>
    %83 = tpu.matmul %82, %70, %cst_27 {dimension_numbers = #tpu.dot_dimension_numbers<[1], [0], [0], [1], [0, 0, 1, 1], [], []>} : vector<8x8xbf16>, vector<8x16xbf16>, vector<8x16xf32> -> vector<8x16xf32>
    %84 = arith.truncf %83 : vector<8x16xf32> to vector<8x16xbf16>
    %c0_28 = arith.constant 0 : index
    %c32 = arith.constant 32 : index
    %85 = vector.load %arg8[%c0_28, %c32] : memref<16x64xbf16, #tpu.memory_space<vmem>>, vector<8x16xbf16>
    tpu.vector_store %arg8[%c0_28, %c32], %84 {strides = array<i32>} : memref<16x64xbf16, #tpu.memory_space<vmem>>, vector<8x16xbf16>,
    %86 = vector.extract_strided_slice %34 {offsets = [0, 112], sizes = [8, 16], strides = [1, 1]} : vector<16x192xbf16> to vector<8x16xbf16>
    %87 = vector.extract_strided_slice %34 {offsets = [0, 176], sizes = [8, 16], strides = [1, 1]} : vector<16x192xbf16> to vector<8x16xbf16>
    %88 = vector.extract_strided_slice %34 {offsets = [0, 48], sizes = [8, 16], strides = [1, 1]} : vector<16x192xbf16> to vector<8x16xbf16>
    %cst_29 = arith.constant dense<0.000000e+00> : vector<8x8xf32>
    %89 = tpu.matmul %88, %86, %cst_29 {dimension_numbers = #tpu.dot_dimension_numbers<[1], [1], [0], [0], [0, 0, 1, 0], [], []>} : vector<8x16xbf16>, vector<8x16xbf16>, vector<8x8xf32> -> vector<8x8xf32>
    %cst_30 = arith.constant dense<0xFF800000> : vector<8xf32>
    %90 = vector.multi_reduction <maximumf>, %89, %cst_30 [1] : vector<8x8xf32> to vector<8xf32>
    %91 = vector.shape_cast %90 : vector<8xf32> to vector<8x1xf32>
    %92 = vector.broadcast %91 : vector<8x1xf32> to vector<8x8xf32>
    %93 = arith.subf %89, %92 : vector<8x8xf32>
    %94 = math.exp %93 : vector<8x8xf32>
    %cst_31 = arith.constant dense<0.000000e+00> : vector<8xf32>
    %95 = vector.multi_reduction <add>, %94, %cst_31 [1] : vector<8x8xf32> to vector<8xf32>
    %96 = vector.shape_cast %95 : vector<8xf32> to vector<8x1xf32>
    %97 = vector.broadcast %96 : vector<8x1xf32> to vector<8x8xf32>
    %98 = arith.divf %94, %97 : vector<8x8xf32>
    %99 = arith.truncf %98 : vector<8x8xf32> to vector<8x8xbf16>
    %cst_32 = arith.constant dense<0.000000e+00> : vector<8x16xf32>
    %100 = tpu.matmul %99, %87, %cst_32 {dimension_numbers = #tpu.dot_dimension_numbers<[1], [0], [0], [1], [0, 0, 1, 1], [], []>} : vector<8x8xbf16>, vector<8x16xbf16>, vector<8x16xf32> -> vector<8x16xf32>
    %101 = arith.truncf %100 : vector<8x16xf32> to vector<8x16xbf16>
    %c0_33 = arith.constant 0 : index
    %c48 = arith.constant 48 : index
    %102 = vector.load %arg8[%c0_33, %c48] : memref<16x64xbf16, #tpu.memory_space<vmem>>, vector<8x16xbf16>
    tpu.vector_store %arg8[%c0_33, %c48], %101 {strides = array<i32>} : memref<16x64xbf16, #tpu.memory_space<vmem>>, vector<8x16xbf16>,
    %103 = vector.extract_strided_slice %34 {offsets = [8, 64], sizes = [8, 16], strides = [1, 1]} : vector<16x192xbf16> to vector<8x16xbf16>
    %104 = vector.extract_strided_slice %34 {offsets = [8, 128], sizes = [8, 16], strides = [1, 1]} : vector<16x192xbf16> to vector<8x16xbf16>
    %105 = vector.extract_strided_slice %34 {offsets = [8, 0], sizes = [8, 16], strides = [1, 1]} : vector<16x192xbf16> to vector<8x16xbf16>
    %cst_34 = arith.constant dense<0.000000e+00> : vector<8x8xf32>
    %106 = tpu.matmul %105, %103, %cst_34 {dimension_numbers = #tpu.dot_dimension_numbers<[1], [1], [0], [0], [0, 0, 1, 0], [], []>} : vector<8x16xbf16>, vector<8x16xbf16>, vector<8x8xf32> -> vector<8x8xf32>
    %cst_35 = arith.constant dense<0xFF800000> : vector<8xf32>
    %107 = vector.multi_reduction <maximumf>, %106, %cst_35 [1] : vector<8x8xf32> to vector<8xf32>
    %108 = vector.shape_cast %107 : vector<8xf32> to vector<8x1xf32>
    %109 = vector.broadcast %108 : vector<8x1xf32> to vector<8x8xf32>
    %110 = arith.subf %106, %109 : vector<8x8xf32>
    %111 = math.exp %110 : vector<8x8xf32>
    %cst_36 = arith.constant dense<0.000000e+00> : vector<8xf32>
    %112 = vector.multi_reduction <add>, %111, %cst_36 [1] : vector<8x8xf32> to vector<8xf32>
    %113 = vector.shape_cast %112 : vector<8xf32> to vector<8x1xf32>
    %114 = vector.broadcast %113 : vector<8x1xf32> to vector<8x8xf32>
    %115 = arith.divf %111, %114 : vector<8x8xf32>
    %116 = arith.truncf %115 : vector<8x8xf32> to vector<8x8xbf16>
    %cst_37 = arith.constant dense<0.000000e+00> : vector<8x16xf32>
    %117 = tpu.matmul %116, %104, %cst_37 {dimension_numbers = #tpu.dot_dimension_numbers<[1], [0], [0], [1], [0, 0, 1, 1], [], []>} : vector<8x8xbf16>, vector<8x16xbf16>, vector<8x16xf32> -> vector<8x16xf32>
    %118 = arith.truncf %117 : vector<8x16xf32> to vector<8x16xbf16>
    %c8 = arith.constant 8 : index
    %c0_38 = arith.constant 0 : index
    %119 = vector.load %arg8[%c8, %c0_38] : memref<16x64xbf16, #tpu.memory_space<vmem>>, vector<8x16xbf16>
    tpu.vector_store %arg8[%c8, %c0_38], %118 {strides = array<i32>} : memref<16x64xbf16, #tpu.memory_space<vmem>>, vector<8x16xbf16>,
    %120 = vector.extract_strided_slice %34 {offsets = [8, 80], sizes = [8, 16], strides = [1, 1]} : vector<16x192xbf16> to vector<8x16xbf16>
    %121 = vector.extract_strided_slice %34 {offsets = [8, 144], sizes = [8, 16], strides = [1, 1]} : vector<16x192xbf16> to vector<8x16xbf16>
    %122 = vector.extract_strided_slice %34 {offsets = [8, 16], sizes = [8, 16], strides = [1, 1]} : vector<16x192xbf16> to vector<8x16xbf16>
    %cst_39 = arith.constant dense<0.000000e+00> : vector<8x8xf32>
    %123 = tpu.matmul %122, %120, %cst_39 {dimension_numbers = #tpu.dot_dimension_numbers<[1], [1], [0], [0], [0, 0, 1, 0], [], []>} : vector<8x16xbf16>, vector<8x16xbf16>, vector<8x8xf32> -> vector<8x8xf32>
    %cst_40 = arith.constant dense<0xFF800000> : vector<8xf32>
    %124 = vector.multi_reduction <maximumf>, %123, %cst_40 [1] : vector<8x8xf32> to vector<8xf32>
    %125 = vector.shape_cast %124 : vector<8xf32> to vector<8x1xf32>
    %126 = vector.broadcast %125 : vector<8x1xf32> to vector<8x8xf32>
    %127 = arith.subf %123, %126 : vector<8x8xf32>
    %128 = math.exp %127 : vector<8x8xf32>
    %cst_41 = arith.constant dense<0.000000e+00> : vector<8xf32>
    %129 = vector.multi_reduction <add>, %128, %cst_41 [1] : vector<8x8xf32> to vector<8xf32>
    %130 = vector.shape_cast %129 : vector<8xf32> to vector<8x1xf32>
    %131 = vector.broadcast %130 : vector<8x1xf32> to vector<8x8xf32>
    %132 = arith.divf %128, %131 : vector<8x8xf32>
    %133 = arith.truncf %132 : vector<8x8xf32> to vector<8x8xbf16>
    %cst_42 = arith.constant dense<0.000000e+00> : vector<8x16xf32>
    %134 = tpu.matmul %133, %121, %cst_42 {dimension_numbers = #tpu.dot_dimension_numbers<[1], [0], [0], [1], [0, 0, 1, 1], [], []>} : vector<8x8xbf16>, vector<8x16xbf16>, vector<8x16xf32> -> vector<8x16xf32>
    %135 = arith.truncf %134 : vector<8x16xf32> to vector<8x16xbf16>
    %c8_43 = arith.constant 8 : index
    %c16_44 = arith.constant 16 : index
    %136 = vector.load %arg8[%c8_43, %c16_44] : memref<16x64xbf16, #tpu.memory_space<vmem>>, vector<8x16xbf16>
    tpu.vector_store %arg8[%c8_43, %c16_44], %135 {strides = array<i32>} : memref<16x64xbf16, #tpu.memory_space<vmem>>, vector<8x16xbf16>,
    %137 = vector.extract_strided_slice %34 {offsets = [8, 96], sizes = [8, 16], strides = [1, 1]} : vector<16x192xbf16> to vector<8x16xbf16>
    %138 = vector.extract_strided_slice %34 {offsets = [8, 160], sizes = [8, 16], strides = [1, 1]} : vector<16x192xbf16> to vector<8x16xbf16>
    %139 = vector.extract_strided_slice %34 {offsets = [8, 32], sizes = [8, 16], strides = [1, 1]} : vector<16x192xbf16> to vector<8x16xbf16>
    %cst_45 = arith.constant dense<0.000000e+00> : vector<8x8xf32>
    %140 = tpu.matmul %139, %137, %cst_45 {dimension_numbers = #tpu.dot_dimension_numbers<[1], [1], [0], [0], [0, 0, 1, 0], [], []>} : vector<8x16xbf16>, vector<8x16xbf16>, vector<8x8xf32> -> vector<8x8xf32>
    %cst_46 = arith.constant dense<0xFF800000> : vector<8xf32>
    %141 = vector.multi_reduction <maximumf>, %140, %cst_46 [1] : vector<8x8xf32> to vector<8xf32>
    %142 = vector.shape_cast %141 : vector<8xf32> to vector<8x1xf32>
    %143 = vector.broadcast %142 : vector<8x1xf32> to vector<8x8xf32>
    %144 = arith.subf %140, %143 : vector<8x8xf32>
    %145 = math.exp %144 : vector<8x8xf32>
    %cst_47 = arith.constant dense<0.000000e+00> : vector<8xf32>
    %146 = vector.multi_reduction <add>, %145, %cst_47 [1] : vector<8x8xf32> to vector<8xf32>
    %147 = vector.shape_cast %146 : vector<8xf32> to vector<8x1xf32>
    %148 = vector.broadcast %147 : vector<8x1xf32> to vector<8x8xf32>
    %149 = arith.divf %145, %148 : vector<8x8xf32>
    %150 = arith.truncf %149 : vector<8x8xf32> to vector<8x8xbf16>
    %cst_48 = arith.constant dense<0.000000e+00> : vector<8x16xf32>
    %151 = tpu.matmul %150, %138, %cst_48 {dimension_numbers = #tpu.dot_dimension_numbers<[1], [0], [0], [1], [0, 0, 1, 1], [], []>} : vector<8x8xbf16>, vector<8x16xbf16>, vector<8x16xf32> -> vector<8x16xf32>
    %152 = arith.truncf %151 : vector<8x16xf32> to vector<8x16xbf16>
    %c8_49 = arith.constant 8 : index
    %c32_50 = arith.constant 32 : index
    %153 = vector.load %arg8[%c8_49, %c32_50] : memref<16x64xbf16, #tpu.memory_space<vmem>>, vector<8x16xbf16>
    tpu.vector_store %arg8[%c8_49, %c32_50], %152 {strides = array<i32>} : memref<16x64xbf16, #tpu.memory_space<vmem>>, vector<8x16xbf16>,
    %154 = vector.extract_strided_slice %34 {offsets = [8, 112], sizes = [8, 16], strides = [1, 1]} : vector<16x192xbf16> to vector<8x16xbf16>
    %155 = vector.extract_strided_slice %34 {offsets = [8, 176], sizes = [8, 16], strides = [1, 1]} : vector<16x192xbf16> to vector<8x16xbf16>
    %156 = vector.extract_strided_slice %34 {offsets = [8, 48], sizes = [8, 16], strides = [1, 1]} : vector<16x192xbf16> to vector<8x16xbf16>
    %cst_51 = arith.constant dense<0.000000e+00> : vector<8x8xf32>
    %157 = tpu.matmul %156, %154, %cst_51 {dimension_numbers = #tpu.dot_dimension_numbers<[1], [1], [0], [0], [0, 0, 1, 0], [], []>} : vector<8x16xbf16>, vector<8x16xbf16>, vector<8x8xf32> -> vector<8x8xf32>
    %cst_52 = arith.constant dense<0xFF800000> : vector<8xf32>
    %158 = vector.multi_reduction <maximumf>, %157, %cst_52 [1] : vector<8x8xf32> to vector<8xf32>
    %159 = vector.shape_cast %158 : vector<8xf32> to vector<8x1xf32>
    %160 = vector.broadcast %159 : vector<8x1xf32> to vector<8x8xf32>
    %161 = arith.subf %157, %160 : vector<8x8xf32>
    %162 = math.exp %161 : vector<8x8xf32>
    %cst_53 = arith.constant dense<0.000000e+00> : vector<8xf32>
    %163 = vector.multi_reduction <add>, %162, %cst_53 [1] : vector<8x8xf32> to vector<8xf32>
    %164 = vector.shape_cast %163 : vector<8xf32> to vector<8x1xf32>
    %165 = vector.broadcast %164 : vector<8x1xf32> to vector<8x8xf32>
    %166 = arith.divf %162, %165 : vector<8x8xf32>
    %167 = arith.truncf %166 : vector<8x8xf32> to vector<8x8xbf16>
    %cst_54 = arith.constant dense<0.000000e+00> : vector<8x16xf32>
    %168 = tpu.matmul %167, %155, %cst_54 {dimension_numbers = #tpu.dot_dimension_numbers<[1], [0], [0], [1], [0, 0, 1, 1], [], []>} : vector<8x8xbf16>, vector<8x16xbf16>, vector<8x16xf32> -> vector<8x16xf32>
    %169 = arith.truncf %168 : vector<8x16xf32> to vector<8x16xbf16>
    %c8_55 = arith.constant 8 : index
    %c48_56 = arith.constant 48 : index
    %170 = vector.load %arg8[%c8_55, %c48_56] : memref<16x64xbf16, #tpu.memory_space<vmem>>, vector<8x16xbf16>
    tpu.vector_store %arg8[%c8_55, %c48_56], %169 {strides = array<i32>} : memref<16x64xbf16, #tpu.memory_space<vmem>>, vector<8x16xbf16>,
    %c0_57 = arith.constant 0 : index
    %c0_58 = arith.constant 0 : index
    %171 = vector.load %arg8[%c0_57, %c0_58] : memref<16x64xbf16, #tpu.memory_space<vmem>>, vector<16x64xbf16>
    %c0_59 = arith.constant 0 : index
    %c0_60 = arith.constant 0 : index
    %172 = vector.load %arg5[%c0_59, %c0_60] : memref<64x32xbf16, #tpu.memory_space<vmem>>, vector<64x32xbf16>
    %cst_61 = arith.constant dense<0.000000e+00> : vector<16x32xf32>
    %173 = tpu.matmul %171, %172, %cst_61 {dimension_numbers = #tpu.dot_dimension_numbers<[1], [0], [0], [1], [0, 0, 1, 1], [], []>} : vector<16x64xbf16>, vector<64x32xbf16>, vector<16x32xf32> -> vector<16x32xf32>
    %c0_62 = arith.constant 0 : index
    %c0_63 = arith.constant 0 : index
    %174 = vector.load %arg6[%c0_62, %c0_63] : memref<1x32xf32, #tpu.memory_space<vmem>>, vector<1x32xf32>
    %175 = vector.shape_cast %174 : vector<1x32xf32> to vector<32xf32>
    %176 = vector.shape_cast %175 : vector<32xf32> to vector<1x32xf32>
    %177 = vector.broadcast %176 : vector<1x32xf32> to vector<16x32xf32>
    %178 = arith.addf %173, %177 : vector<16x32xf32>
    %179 = vector.shape_cast %178 : vector<16x32xf32> to vector<2x8x32xf32>
    %c0_64 = arith.constant 0 : index
    %c0_65 = arith.constant 0 : index
    %c0_66 = arith.constant 0 : index
    %180 = vector.load %arg7[%c0_64, %c0_65, %c0_66] : memref<2x8x32xf32, #tpu.memory_space<vmem>>, vector<2x8x32xf32>
    tpu.vector_store %arg7[%c0_64, %c0_65, %c0_66], %179 {strides = array<i32>} : memref<2x8x32xf32, #tpu.memory_space<vmem>>, vector<2x8x32xf32>,
    return
  }
  func.func @transform_0(%arg0: i32) -> (i32, i32, i32) {
    %c0_i32 = arith.constant 0 : i32
    %c0_i32_0 = arith.constant 0 : i32
    %c0_i32_1 = arith.constant 0 : i32
    return %arg0, %c0_i32, %c0_i32_0 : i32, i32, i32
  }
  func.func @transform_1(%arg0: i32) -> (i32, i32) {
    %c0_i32 = arith.constant 0 : i32
    %c0_i32_0 = arith.constant 0 : i32
    %c0_i32_1 = arith.constant 0 : i32
    return %c0_i32, %c0_i32_0 : i32, i32
  }
  func.func @transform_2(%arg0: i32) -> (i32, i32) {
    %c0_i32 = arith.constant 0 : i32
    %c0_i32_0 = arith.constant 0 : i32
    %c0_i32_1 = arith.constant 0 : i32
    return %c0_i32, %c0_i32_0 : i32, i32
  }
  func.func @transform_3(%arg0: i32) -> (i32, i32) {
    %c0_i32 = arith.constant 0 : i32
    %c0_i32_0 = arith.constant 0 : i32
    %c0_i32_1 = arith.constant 0 : i32
    return %c0_i32, %c0_i32_0 : i32, i32
  }
  func.func @transform_4(%arg0: i32) -> (i32, i32) {
    %c0_i32 = arith.constant 0 : i32
    %c0_i32_0 = arith.constant 0 : i32
    %c0_i32_1 = arith.constant 0 : i32
    return %c0_i32, %c0_i32_0 : i32, i32
  }
  func.func @transform_5(%arg0: i32) -> (i32, i32) {
    %c0_i32 = arith.constant 0 : i32
    %c0_i32_0 = arith.constant 0 : i32
    %c0_i32_1 = arith.constant 0 : i32
    return %c0_i32, %c0_i32_0 : i32, i32
  }
  func.func @transform_6(%arg0: i32) -> (i32, i32, i32) {
    %c0_i32 = arith.constant 0 : i32
    %c0_i32_0 = arith.constant 0 : i32
    %c0_i32_1 = arith.constant 0 : i32
    return %arg0, %c0_i32, %c0_i32_0 : i32, i32, i32
  }
}

</mosaic_0001>

<bundles_post_ra>
// kernel: tpu_custom_call.1
= control target key start
LH: loop header
LB: loop body
LE: loop exit
PB: predicated region body
PF: predicated region fallthrough
CT: control target
= control target key end

     0   :  { %vm29_vm0 = vcmask 261120   ;;  %s1719_s0 = inlined_call_operand.vmem [shape: bf16[2,8,32], index: 0, kind: input, shape index: {}]   ;;  %s1720_s1 = inlined_call_operand.vmem [shape: f32[1,32], index: 1, kind: input, shape index: {}]   ;;  %s1721_s2 = inlined_call_operand.vmem [shape: f32[1,32], index: 2, kind: input, shape index: {}]   ;;  %s1722_s3 = inlined_call_operand.vmem [shape: bf16[32,192], index: 3, kind: input, shape index: {}]   ;;  %s1723_s4 = inlined_call_operand.vmem [shape: bf16[64,32], index: 4, kind: input, shape index: {}]   ;;  %s1724_s5 = inlined_call_operand.vmem [shape: f32[1,32], index: 5, kind: input, shape index: {}]   ;;  %s1725_s6 = inlined_call_operand.hbm [shape: f32[2,8,32], index: 6, kind: output, shape index: {}]  }
   0x1   :  { %v1214_v0 = vld [vmem:[%s1719_s0] sm:$0xff]  }
   0x2   :  { %v1215_v1 = vunpack.c.l.bf16 %v1214_v0  ;;  %v1216_v2 = vunpack.c.h.bf16 %v1214_v0 }
   0x4   :  { %v30_v3 = vsel %vm29_vm0, %v1215_v1, 0.0 }
   0x5   :  { %31 = vadd.xlane.f32.xlu0 %v30_v3 }
   0x6   :  { %11 = vsyncpa [#allocation4], 0  ;;  %v33_v4 = vsel %vm29_vm0, %v1216_v2, 0.0  ;;  %v1375_v15 = vld [vmem:[%s1722_s3 + $0x4] ss:$8 sps:$4 sm:$0xff]   ;;  %v1445_v19 = vmov 0  }
   0x7   :  { %v1377_v16 = vld [vmem:[%s1722_s3] ss:$8 sps:$4 sm:$0xff]   ;;  %103 = vmatprep.subr.bf16.mxu0 %v1375_v15  ;;  %v1378_v17 = vld [vmem:[%s1722_s3 + $0x14] ss:$8 sps:$4 sm:$0xff]   ;;  %v1380_v18 = vld [vmem:[%s1722_s3 + $0x10] ss:$8 sps:$4 sm:$0xff]   ;;  %135 = vmatprep.mubr.bf16.mxu0 %v1445_v19 }
   0x8   :  { %104 = vmatpush1.bf16.msra.mxu0 %v1377_v16  ;;  %v1184_v28 = vld [vmem:[%s1720_s1] ss:$0 sm:$0xff]  ;;  %v1446_v37 = vmov 0.0   ;;  %vm1447_vm1 = vmmov 0   ;;  %vm214_vm2 = vcmask 1043456   ;;  %s1448_s1 = smov 48  }
   0x9   :  { %34 = vadd.xlane.f32.xlu0 %v33_v4  ;;  %105 = vmatprep.subr.bf16.mxu0 %v1378_v17  ;;  %v1185_v32 = vld [vmem:[%s1721_s2] ss:$0 sm:$0xff]  ;;  %s1449_s2 = smov 64   ;;  %s1450_s9 = smov 112   ;;  %vm151_vm3 = vcmask 130048   ;;  %vm198_vm4 = vcmask 64512  }
   0xa   :  { %1254 = vmatprep.subr.bf16.mxu1 %v1446_v37  ;;  %1256 = vmatprep.mubr.msk.bf16.mxu1 %vm1447_vm1, %v1446_v37  ;;  %s1451_s10 = smov 96   ;;  %s1452_s11 = smov 32   ;;  %vm259_vm5 = vcmask 125952   ;;  %vm725_vm6 = vcmask 130052   ;;  %vm377_vm7 = vcmask 257152   ;;  %vm494_vm8 = vcmask 388352  }
   0xb   :  { %s1453_s12 = smov 80   ;;  %s1454_s13 = smov 16   ;;  %vm611_vm9 = vcmask 519552   ;;  %vm843_vm10 = vcmask 261252   ;;  %vm961_vm11 = vcmask 392452   ;;  %vm1079_vm12 = vcmask 523652  }
   0xc   :  { %106 = vmatpush1.bf16.msra.mxu0 %v1380_v18  ;;  %vm1121_vm13 = vcmask 523264   ;;  %s1455_s0 = smov [#allocation3]  }
   0xd   :  { %1260 = vmatprep.subr.bf16.mxu0 %v1446_v37  ;;  %s1173_s23 = sshll.u32 %s1455_s0, 4  ;;  %s1174_s23 = int_to_ptr.vmem [resolvable:$true] %s1173_s23 }
   0xe   :  { %s1421_s24 = scalar_lea.vmem %s1174_s23, 256  ;;  %p1426_p1 = scmp.lt.s32.totalorder %s1174_s23, %s1174_s23 }
   0xf   :  { %p1422_p0 = scmp.ne.s32.totalorder %s1174_s23, %s1421_s24  ;;  %p1427_p2 = scmp.lt.s32.totalorder %s1421_s24, %s1421_s24 }
  0x11   :  { %p1428_p3 = por %p1427_p2, %p1426_p1 }
  0x13   :  { %p1429_p4 = pnand %p1428_p3, %p1422_p0 }
  0x92   :  { %v32_v5 = vpop.xlane.xlu0 %31 }
  0x93   :  { %v37_v6 = vmul.f32 0.03125, %v32_v5 }
  0x95   :  { %v39_v7 = vsub.f32 %v1215_v1, %v37_v6 }
  0x96   :  { %v35_v8 = vpop.xlane.xlu0 %34 }
  0x97   :  { %v38_v9 = vmul.f32 0.03125, %v35_v8  ;;  %v41_v10 = vmul.f32 %v39_v7, %v39_v7 }
  0x99   :  { %v40_v11 = vsub.f32 %v1216_v2, %v38_v9  ;;  %v43_v12 = vsel %vm29_vm0, %v41_v10, 0.0 }
  0x9a   :  { %44 = vadd.xlane.f32.xlu1 %v43_v12 }
  0x9b   :  { %v42_v13 = vmul.f32 %v40_v11, %v40_v11 }
  0x9d   :  { %v46_v14 = vsel %vm29_vm0, %v42_v13, 0.0 }
  0x9e   :  { %47 = vadd.xlane.f32.xlu1 %v46_v14 }
 0x127   :  { %v45_v20 = vpop.xlane.xlu1 %44 }
 0x128   :  { %v49_v21 = vmul.f32 0.03125, %v45_v20 }
 0x12a   :  { %v51_v22 = vadd.f32 1e-05, %v49_v21 }
 0x12b   :  { %v48_v23 = vpop.xlane.xlu1 %47 }
 0x12c   :  { %1385 = vrsqrt.f32 %v51_v22  ;;  %v50_v24 = vmul.f32 0.03125, %v48_v23 }
 0x12e   :  { %v52_v25 = vadd.f32 1e-05, %v50_v24 }
 0x130   :  { %1387 = vrsqrt.f32 %v52_v25 }
 0x136   :  { %v1386_v26 = vpop.eup %1385 }
 0x137   :  { %v55_v27 = vmul.f32 %v1386_v26, %v39_v7 }
 0x139   :  { %v64_v31 = vmul.f32 %v1184_v28, %v55_v27 }
 0x13a   :  { %v1388_v29 = vpop.eup %1387 }
 0x13b   :  { %v56_v30 = vmul.f32 %v1388_v29, %v40_v11  ;;  %v73_v34 = vadd.f32 %v1185_v32, %v64_v31 }
 0x13d   :  { %v65_v33 = vmul.f32 %v1184_v28, %v56_v30 }
 0x13f   :  { %v74_v35 = vadd.f32 %v1185_v32, %v65_v33 }
 0x141   :  { %v75_v36 = vpack.c.bf16 %v74_v35, %v73_v34 }
 0x143   :  { %1190 = vmatmul.mubr.msk.bf16.vlgmr.msra.gmra.mrb[0].mxu0 %vm29_vm0, %v75_v36 }
 0x144   :  { %1262 = vmatprep.mubr.msk.bf16.mxu0 %vm1447_vm1, %v1446_v37 }
 0x216   :  { %v137_v38 = vpop.f32.mrb[0].mxu0 }
 0x217   :  { %v139_v39 = vpop.f32.mrb[1].mxu0 }
 0x218   :  { %v141_v40 = vpop.f32.mrb[2].mxu0 }
 0x219   :  { %v146_v41 = vpack.c.bf16 %v141_v40, %v137_v38  ;;  %v143_v42 = vpop.f32.mrb[3].mxu0 }
 0x21a   :  { %v1525_v43 = vpack.c.bf16 %v143_v42, %v139_v39 }
 0x21b   :  { %263 = vrot.lane.b32.xlu1 %v146_v41, %s1448_s1  ;;  %149 = vrot.lane.b32.xlu0 %v146_v41, %s1449_s2  ;;  %v613_v45 = vrot.slane %v146_v41, 4 }
 0x21c   :  { %v216_v44 = vsel %vm214_vm2, %v1525_v43, 0 }
 0x21d   :  { %1261 = vmatpush3.bf16.msra.mxu0 %v216_v44 }
 0x21e   :  { %1272 = vmatprep.subr.bf16.mxu0 %v1446_v37 }
 0x21f   :  { %261 = vrot.lane.b32.xlu1 %v146_v41, %s1450_s9  ;;  %379 = vrot.lane.b32.xlu0 %v146_v41, %s1451_s10 }
 0x223   :  { %381 = vrot.lane.b32.xlu1 %v146_v41, %s1452_s11  ;;  %496 = vrot.lane.b32.xlu0 %v146_v41, %s1453_s12 }
 0x227   :  { %498 = vrot.lane.b32.xlu1 %v146_v41, %s1454_s13  ;;  %729 = vrot.lane.b32.xlu0 %v613_v45, %s1448_s1 }
 0x22b   :  { %847 = vrot.lane.b32.xlu0 %v613_v45, %s1452_s11  ;;  %614 = vrot.lane.b32.xlu1 %v613_v45, %s1449_s2 }
 0x22f   :  { %965 = vrot.lane.b32.xlu0 %v613_v45, %s1454_s13  ;;  %727 = vrot.lane.b32.xlu1 %v613_v45, %s1450_s9 }
 0x233   :  { %845 = vrot.lane.b32.xlu1 %v613_v45, %s1451_s10 }
 0x237   :  { %963 = vrot.lane.b32.xlu1 %v613_v45, %s1453_s12 }
 0x28d   :  { %v150_v46 = vpop.permute.xlu0 %149  ;;  %v264_v48 = vpop.permute.xlu1 %263 }
 0x28e   :  { %v156_v47 = vsel %vm151_vm3, %v150_v46, 0  ;;  %v269_v50 = vsel %vm151_vm3, %v264_v48, 0 }
 0x28f   :  { %1255 = vmatpush3.bf16.xpose.msra.mxu1 %v156_v47 }
 0x290   :  { %1266 = vmatprep.subr.bf16.mxu1 %v1446_v37 }
 0x291   :  { %v262_v49 = vpop.permute.xlu1 %261  ;;  %v380_v54 = vpop.permute.xlu0 %379 }
 0x295   :  { %v382_v51 = vpop.permute.xlu1 %381  ;;  %v497_v57 = vpop.permute.xlu0 %496 }
 0x296   :  { %1257 = vmatmul.mubr.msk.bf16.vlgmr.msra.gmra.mrb[0].mxu1 %vm151_vm3, %v146_v41  ;;  %v387_v52 = vsel %vm151_vm3, %v382_v51, 0 }
 0x297   :  { %1267 = vmatpush3.bf16.xpose.msra.mxu1 %v269_v50  ;;  %1268 = vmatprep.mubr.msk.bf16.mxu1 %vm1447_vm1, %v1446_v37 }
 0x298   :  { %1278 = vmatprep.subr.bf16.mxu1 %v1446_v37 }
 0x299   :  { %v499_v53 = vpop.permute.xlu1 %498  ;;  %v730_v59 = vpop.permute.xlu0 %729 }
 0x29a   :  { %v504_v55 = vsel %vm151_vm3, %v499_v53, 0  ;;  %v735_v60 = vsel %vm151_vm3, %v730_v59, 0 }
 0x29d   :  { %v615_v56 = vpop.permute.xlu1 %614  ;;  %v848_v61 = vpop.permute.xlu0 %847 }
 0x29e   :  { %1269 = vmatmul.mubr.msk.bf16.vlgmr.msra.gmra.mrb[4].mxu1 %vm151_vm3, %v262_v49  ;;  %v620_v58 = vsel %vm151_vm3, %v615_v56, 0  ;;  %v853_v63 = vsel %vm151_vm3, %v848_v61, 0 }
 0x29f   :  { %1279 = vmatpush3.bf16.xpose.msra.mxu1 %v387_v52  ;;  %1280 = vmatprep.mubr.msk.bf16.mxu1 %vm1447_vm1, %v1446_v37 }
 0x2a0   :  { %1290 = vmatprep.subr.bf16.mxu1 %v1446_v37 }
 0x2a1   :  { %v728_v62 = vpop.permute.xlu1 %727  ;;  %v966_v0 = vpop.permute.xlu0 %965 }
 0x2a2   :  { %v971_v2 = vsel %vm151_vm3, %v966_v0, 0 }
 0x2a5   :  { %v846_v1 = vpop.permute.xlu1 %845 }
 0x2a6   :  { %1281 = vmatmul.mubr.msk.bf16.vlgmr.msra.gmra.mrb[8].mxu1 %vm151_vm3, %v380_v54 }
 0x2a7   :  { %1291 = vmatpush3.bf16.xpose.msra.mxu1 %v504_v55  ;;  %1292 = vmatprep.mubr.msk.bf16.mxu1 %vm1447_vm1, %v1446_v37 }
 0x2a8   :  { %1302 = vmatprep.subr.bf16.mxu1 %v1446_v37 }
 0x2a9   :  { %v964_v3 = vpop.permute.xlu1 %963 }
 0x2ae   :  { %1293 = vmatmul.mubr.msk.bf16.vlgmr.msra.gmra.mrb[12].mxu1 %vm151_vm3, %v497_v57 }
 0x2af   :  { %1303 = vmatpush3.bf16.xpose.msra.mxu1 %v620_v58  ;;  %1304 = vmatprep.mubr.msk.bf16.mxu1 %vm1447_vm1, %v1446_v37 }
 0x2b0   :  { %1314 = vmatprep.subr.bf16.mxu1 %v1446_v37 }
 0x2b6   :  { %1305 = vmatmul.mubr.msk.bf16.vlgmr.msra.gmra.mrb[16].mxu1 %vm151_vm3, %v613_v45 }
 0x2b7   :  { %1315 = vmatpush3.bf16.xpose.msra.mxu1 %v735_v60  ;;  %1316 = vmatprep.mubr.msk.bf16.mxu1 %vm1447_vm1, %v1446_v37 }
 0x2b8   :  { %1326 = vmatprep.subr.bf16.mxu1 %v1446_v37 }
 0x2be   :  { %1317 = vmatmul.mubr.msk.bf16.vlgmr.msra.gmra.mrb[20].mxu1 %vm151_vm3, %v728_v62 }
 0x2bf   :  { %1327 = vmatpush3.bf16.xpose.msra.mxu1 %v853_v63  ;;  %1328 = vmatprep.mubr.msk.bf16.mxu1 %vm1447_vm1, %v1446_v37 }
 0x2c0   :  { %1338 = vmatprep.subr.bf16.mxu1 %v1446_v37 }
 0x2c6   :  { %1329 = vmatmul.mubr.msk.bf16.vlgmr.msra.gmra.mrb[24].mxu1 %vm151_vm3, %v846_v1 }
 0x2c7   :  { %1339 = vmatpush3.bf16.xpose.msra.mxu1 %v971_v2  ;;  %1340 = vmatprep.mubr.msk.bf16.mxu1 %vm1447_vm1, %v1446_v37 }
 0x2c8   :  { %1350 = vmatprep.subr.bf16.mxu1 %v1446_v37 }
 0x2ce   :  { %1341 = vmatmul.mubr.msk.bf16.vlgmr.msra.gmra.mrb[28].mxu1 %vm151_vm3, %v964_v3 }
 0x2cf   :  { %1358 = vmatprep.mubr.msk.bf16.mxu1 %vm1447_vm1, %v1446_v37 }
 0x369   :  { %v192_v4 = vpop.f32.mrb[0].mxu1 }
 0x36a   :  { %v1258_v5 = vpop.f32.mrb[1].mxu1  ;;  %v199_v6 = vsel %vm198_vm4, %v192_v4, -inf }
 0x36b   :  { %v195_v7 = vpop.f32.mrb[2].mxu1  ;;  %200 = vmax.xlane.f32.xlu0 %v199_v6 }
 0x36c   :  { %v1259_v8 = vpop.f32.mrb[3].mxu1  ;;  %v1615_v7 = vrot.slane %v1525_v43, 4 }
 0x371   :  { %v305_v9 = vpop.f32.mrb[4].mxu1 }
 0x372   :  { %v1270_v10 = vpop.f32.mrb[5].mxu1  ;;  %v311_v11 = vsel %vm198_vm4, %v305_v9, -inf }
 0x373   :  { %v308_v12 = vpop.f32.mrb[6].mxu1  ;;  %312 = vmax.xlane.f32.xlu1 %v311_v11 }
 0x374   :  { %v1271_v13 = vpop.f32.mrb[7].mxu1 }
 0x379   :  { %v423_v14 = vpop.f32.mrb[8].mxu1 }
 0x37a   :  { %v1282_v15 = vpop.f32.mrb[9].mxu1  ;;  %v429_v16 = vsel %vm198_vm4, %v423_v14, -inf }
 0x37b   :  { %v426_v17 = vpop.f32.mrb[10].mxu1  ;;  %430 = vmax.xlane.f32.xlu0 %v429_v16 }
 0x37c   :  { %v1283_v18 = vpop.f32.mrb[11].mxu1 }
 0x381   :  { %v540_v19 = vpop.f32.mrb[12].mxu1 }
 0x382   :  { %v1294_v20 = vpop.f32.mrb[13].mxu1  ;;  %v546_v21 = vsel %vm198_vm4, %v540_v19, -inf }
 0x383   :  { %v543_v22 = vpop.f32.mrb[14].mxu1  ;;  %547 = vmax.xlane.f32.xlu0 %v546_v21 }
 0x384   :  { %v1295_v23 = vpop.f32.mrb[15].mxu1 }
 0x389   :  { %v656_v24 = vpop.f32.mrb[16].mxu1 }
 0x38a   :  { %v1306_v25 = vpop.f32.mrb[17].mxu1  ;;  %v662_v26 = vsel %vm198_vm4, %v656_v24, -inf }
 0x38b   :  { %663 = vmax.xlane.f32.xlu0 %v662_v26  ;;  %v659_v27 = vpop.f32.mrb[18].mxu1 }
 0x38c   :  { %v1307_v28 = vpop.f32.mrb[19].mxu1 }
 0x391   :  { %v1587_v29 = vpop.f32.mrb[20].mxu1 }
 0x392   :  { %v1318_v30 = vpop.f32.mrb[21].mxu1  ;;  %v777_v31 = vsel %vm198_vm4, %v1587_v29, -inf }
 0x393   :  { %778 = vmax.xlane.f32.xlu1 %v777_v31  ;;  %v774_v32 = vpop.f32.mrb[22].mxu1 }
 0x394   :  { %v1319_v33 = vpop.f32.mrb[23].mxu1 }
 0x399   :  { %v889_v34 = vpop.f32.mrb[24].mxu1 }
 0x39a   :  { %v1330_v35 = vpop.f32.mrb[25].mxu1  ;;  %v895_v36 = vsel %vm198_vm4, %v889_v34, -inf }
 0x39b   :  { %896 = vmax.xlane.f32.xlu0 %v895_v36  ;;  %v892_v38 = vpop.f32.mrb[26].mxu1 }
 0x39c   :  { %v1331_v39 = vpop.f32.mrb[27].mxu1 }
 0x3a1   :  { %v1007_v40 = vpop.f32.mrb[28].mxu1 }
 0x3a2   :  { %v1342_v41 = vpop.f32.mrb[29].mxu1  ;;  %v1013_v42 = vsel %vm198_vm4, %v1007_v40, -inf }
 0x3a3   :  { %1014 = vmax.xlane.f32.xlu1 %v1013_v42  ;;  %v1010_v44 = vpop.f32.mrb[30].mxu1 }
 0x3a4   :  { %v1343_v45 = vpop.f32.mrb[31].mxu1 }
 0x3b1   :  { %441 = vrot.lane.b32.xlu0 %v1525_v43, %s1451_s10 }
 0x3b4   :  { %324 = vrot.lane.b32.xlu1 %v1525_v43, %s1450_s9 }
 0x3f8   :  { %v201_v46 = vpop.xlane.xlu0 %200 }
 0x3f9   :  { %v202_v47 = vsub.f32 %v192_v4, %v201_v46 }
 0x3fb   :  { %v203_v48 = vmul.f32 1.442695, %v202_v47  ;;  %v679_v47 = vsel %vm214_vm2, %v1615_v7, 0 }
 0x3fd   :  { %1389 = vpow2.f32 %v203_v48 }
 0x400   :  { %v313_v49 = vpop.xlane.xlu1 %312 }
 0x401   :  { %v314_v50 = vsub.f32 %v305_v9, %v313_v49 }
 0x403   :  { %v315_v51 = vmul.f32 1.442695, %v314_v50 }
 0x405   :  { %1391 = vpow2.f32 %v315_v51 }
 0x407   :  { %v1390_v52 = vpop.eup %1389 }
 0x408   :  { %v431_v53 = vpop.xlane.xlu0 %430  ;;  %v205_v54 = vsel %vm198_vm4, %v1390_v52, 0.0 }
 0x409   :  { %v432_v55 = vsub.f32 %v423_v14, %v431_v53  ;;  %206 = vadd.xlane.f32.xlu0 %v205_v54 }
 0x40b   :  { %v433_v56 = vmul.f32 1.442695, %v432_v55 }
 0x40d   :  { %1393 = vpow2.f32 %v433_v56 }
 0x40f   :  { %v1598_v57 = vpop.eup %1391 }
 0x410   :  { %v548_v58 = vpop.xlane.xlu0 %547  ;;  %v317_v59 = vsel %vm198_vm4, %v1598_v57, 0.0 }
 0x411   :  { %v549_v60 = vsub.f32 %v540_v19, %v548_v58  ;;  %318 = vadd.xlane.f32.xlu1 %v317_v59 }
 0x413   :  { %v550_v61 = vmul.f32 1.442695, %v549_v60 }
 0x415   :  { %1395 = vpow2.f32 %v550_v61 }
 0x417   :  { %v1602_v62 = vpop.eup %1393 }
 0x418   :  { %v664_v63 = vpop.xlane.xlu0 %663  ;;  %v435_v0 = vsel %vm198_vm4, %v1602_v62, 0.0 }
 0x419   :  { %v665_v1 = vsub.f32 %v656_v24, %v664_v63  ;;  %436 = vadd.xlane.f32.xlu0 %v435_v0 }
 0x41b   :  { %v666_v2 = vmul.f32 1.442695, %v665_v1 }
 0x41d   :  { %1397 = vpow2.f32 %v666_v2 }
 0x41f   :  { %v1606_v3 = vpop.eup %1395 }
 0x420   :  { %v552_v4 = vsel %vm198_vm4, %v1606_v3, 0.0  ;;  %v779_v11 = vpop.xlane.xlu1 %778 }
 0x421   :  { %553 = vadd.xlane.f32.xlu1 %v552_v4  ;;  %v780_v12 = vsub.f32 %v1587_v29, %v779_v11 }
 0x423   :  { %v781_v14 = vmul.f32 1.442695, %v780_v12 }
 0x427   :  { %v1610_v5 = vpop.eup %1397 }
 0x428   :  { %v668_v6 = vsel %vm198_vm4, %v1610_v5, 0.0  ;;  %v897_v8 = vpop.xlane.xlu0 %896 }
 0x429   :  { %669 = vadd.xlane.f32.xlu0 %v668_v6  ;;  %v898_v9 = vsub.f32 %v889_v34, %v897_v8 }
 0x42b   :  { %v899_v10 = vmul.f32 1.442695, %v898_v9 }
 0x42c   :  { %v442_v22 = vpop.permute.xlu0 %441 }
 0x42d   :  { %1399 = vpow2.f32 %v899_v10  ;;  %v447_v34 = vsel %vm214_vm2, %v442_v22, 0 }
 0x42e   :  { %1401 = vpow2.f32 %v781_v14 }
 0x430   :  { %v1015_v13 = vpop.xlane.xlu1 %1014 }
 0x431   :  { %v1016_v15 = vsub.f32 %v1007_v40, %v1015_v13 }
 0x432   :  { %789 = vrot.lane.b32.xlu1 %v1615_v7, %s1450_s9 }
 0x433   :  { %v1017_v16 = vmul.f32 1.442695, %v1016_v15 }
 0x434   :  { %v325_v24 = vpop.permute.xlu1 %324 }
 0x435   :  { %1403 = vpow2.f32 %v1017_v16  ;;  %v330_v29 = vsel %vm214_vm2, %v325_v24, 0 }
 0x437   :  { %v1622_v17 = vpop.eup %1399 }
 0x438   :  { %v901_v18 = vsel %vm198_vm4, %v1622_v17, 0.0  ;;  %v1626_v19 = vpop.eup %1401 }
 0x43f   :  { %558 = vrot.lane.b32.xlu0 %v1525_v43, %s1453_s12  ;;  %v783_v43 = vsel %vm198_vm4, %v1626_v19, 0.0  ;;  %v1630_v20 = vpop.eup %1403 }
 0x440   :  { %v1019_v21 = vsel %vm198_vm4, %v1630_v20, 0.0 }
 0x456   :  { %902 = vadd.xlane.f32.xlu1 %v901_v18 }
 0x45e   :  { %784 = vadd.xlane.f32.xlu0 %v783_v43 }
 0x462   :  { %1020 = vadd.xlane.f32.xlu0 %v1019_v21 }
 0x467   :  { %1025 = vrot.lane.b32.xlu1 %v1615_v7, %s1453_s12 }
 0x478   :  { %907 = vrot.lane.b32.xlu0 %v1615_v7, %s1451_s10 }
 0x496   :  { %v207_v23 = vpop.xlane.xlu0 %206 }
 0x497   :  { %1405 = vrcp.f32 %v207_v23 }
 0x49e   :  { %v319_v25 = vpop.xlane.xlu1 %318 }
 0x49f   :  { %1407 = vrcp.f32 %v319_v25 }
 0x4a1   :  { %v1406_v26 = vpop.eup %1405 }
 0x4a2   :  { %v209_v27 = vmul.f32 %v1406_v26, %v1390_v52 }
 0x4a4   :  { %v210_v28 = vpack.c.bf16 %v209_v27, %v209_v27 }
 0x4a6   :  { %v437_v30 = vpop.xlane.xlu0 %436  ;;  %1263 = vmatmul.mubr.msk.bf16.vlgmr.msra.gmra.mrb[4].mxu0 %vm198_vm4, %v210_v28 }
 0x4a7   :  { %1409 = vrcp.f32 %v437_v30  ;;  %1273 = vmatpush3.bf16.msra.mxu0 %v330_v29  ;;  %1274 = vmatprep.mubr.msk.bf16.mxu0 %vm1447_vm1, %v1446_v37 }
 0x4a8   :  { %1284 = vmatprep.subr.bf16.mxu0 %v1446_v37 }
 0x4a9   :  { %v1408_v31 = vpop.eup %1407 }
 0x4aa   :  { %v321_v32 = vmul.f32 %v1408_v31, %v1598_v57  ;;  %v1381_v31 = vld [vmem:[%s1723_s4] sm:$0xff]  }
 0x4ab   :  { %1351 = vmatpush3.bf16.msra.mxu1 %v1381_v31 }
 0x4ac   :  { %v322_v33 = vpack.c.bf16 %v321_v32, %v321_v32  ;;  %1352 = vmatprep.subr.bf16.mxu1 %v1446_v37 }
 0x4ae   :  { %v554_v35 = vpop.xlane.xlu1 %553  ;;  %1275 = vmatmul.mubr.msk.bf16.vlgmr.msra.gmra.mrb[8].mxu0 %vm198_vm4, %v322_v33 }
 0x4af   :  { %1411 = vrcp.f32 %v554_v35  ;;  %1285 = vmatpush3.bf16.msra.mxu0 %v447_v34  ;;  %1286 = vmatprep.mubr.msk.bf16.mxu0 %vm1447_vm1, %v1446_v37  ;;  %v1382_v35 = vld [vmem:[%s1723_s4 + $0x8] sm:$0xff]  }
 0x4b0   :  { %1296 = vmatprep.subr.bf16.mxu0 %v1446_v37  ;;  %1353 = vmatpush3.bf16.msra.mxu1 %v1382_v35 }
 0x4b1   :  { %v1410_v36 = vpop.eup %1409  ;;  %1354 = vmatprep.subr.bf16.mxu1 %v1446_v37 }
 0x4b2   :  { %v439_v38 = vmul.f32 %v1410_v36, %v1602_v62  ;;  %v790_v50 = vpop.permute.xlu1 %789 }
 0x4b3   :  { %v795_v52 = vsel %vm214_vm2, %v790_v50, 0 }
 0x4b4   :  { %v440_v39 = vpack.c.bf16 %v439_v38, %v439_v38 }
 0x4b6   :  { %v670_v40 = vpop.xlane.xlu0 %669  ;;  %1287 = vmatmul.mubr.msk.bf16.vlgmr.msra.gmra.mrb[12].mxu0 %vm198_vm4, %v440_v39 }
 0x4b7   :  { %1413 = vrcp.f32 %v670_v40  ;;  %1298 = vmatprep.mubr.msk.bf16.mxu0 %vm1447_vm1, %v1446_v37  ;;  %v1383_v40 = vld [vmem:[%s1723_s4 + $0x10] sm:$0xff]  }
 0x4b8   :  { %1355 = vmatpush3.bf16.msra.mxu1 %v1383_v40 }
 0x4b9   :  { %v1412_v41 = vpop.eup %1411  ;;  %1356 = vmatprep.subr.bf16.mxu1 %v1446_v37 }
 0x4ba   :  { %v556_v42 = vmul.f32 %v1412_v41, %v1606_v3  ;;  %v559_v44 = vpop.permute.xlu0 %558 }
 0x4bb   :  { %v564_v45 = vsel %vm214_vm2, %v559_v44, 0 }
 0x4bc   :  { %1297 = vmatpush3.bf16.msra.mxu0 %v564_v45  ;;  %v557_v46 = vpack.c.bf16 %v556_v42, %v556_v42  ;;  %v1384_v45 = vld [vmem:[%s1723_s4 + $0x18] sm:$0xff]  }
 0x4bd   :  { %1308 = vmatprep.subr.bf16.mxu0 %v1446_v37  ;;  %1357 = vmatpush3.bf16.msra.mxu1 %v1384_v45 }
 0x4bf   :  { %1299 = vmatmul.mubr.msk.bf16.vlgmr.msra.gmra.mrb[16].mxu0 %vm198_vm4, %v557_v46 }
 0x4c0   :  { %1309 = vmatpush3.bf16.msra.mxu0 %v679_v47  ;;  %1310 = vmatprep.mubr.msk.bf16.mxu0 %vm1447_vm1, %v1446_v37 }
 0x4c1   :  { %v1414_v48 = vpop.eup %1413  ;;  %1320 = vmatprep.subr.bf16.mxu0 %v1446_v37 }
 0x4c2   :  { %v672_v49 = vmul.f32 %v1414_v48, %v1610_v5 }
 0x4c4   :  { %v673_v51 = vpack.c.bf16 %v672_v49, %v672_v49 }
 0x4c7   :  { %1311 = vmatmul.mubr.msk.bf16.vlgmr.msra.gmra.mrb[20].mxu0 %vm198_vm4, %v673_v51 }
 0x4c8   :  { %1321 = vmatpush3.bf16.msra.mxu0 %v795_v52  ;;  %1322 = vmatprep.mubr.msk.bf16.mxu0 %vm1447_vm1, %v1446_v37 }
 0x4c9   :  { %1332 = vmatprep.subr.bf16.mxu0 %v1446_v37 }
 0x4e3   :  { %v903_v54 = vpop.xlane.xlu1 %902 }
 0x4e7   :  { %v1026_v63 = vpop.permute.xlu1 %1025 }
 0x4e8   :  { %v1031_v2 = vsel %vm214_vm2, %v1026_v63, 0 }
 0x4eb   :  { %v785_v53 = vpop.xlane.xlu0 %784 }
 0x4ec   :  { %1415 = vrcp.f32 %v785_v53 }
 0x4ed   :  { %1417 = vrcp.f32 %v903_v54 }
 0x4ef   :  { %v1021_v55 = vpop.xlane.xlu0 %1020 }
 0x4f0   :  { %1419 = vrcp.f32 %v1021_v55 }
 0x4f3   :  { %v908_v58 = vpop.permute.xlu0 %907 }
 0x4f4   :  { %v913_v61 = vsel %vm214_vm2, %v908_v58, 0 }
 0x4f6   :  { %v1416_v56 = vpop.eup %1415 }
 0x4f7   :  { %v787_v57 = vmul.f32 %v1416_v56, %v1626_v19  ;;  %v1418_v60 = vpop.eup %1417 }
 0x4f8   :  { %v905_v62 = vmul.f32 %v1418_v60, %v1622_v17  ;;  %v1207_v60 = vld [vmem:[%s1724_s5] ss:$0 sm:$0xff] }
 0x4f9   :  { %v788_v59 = vpack.c.bf16 %v787_v57, %v787_v57 }
 0x4fa   :  { %v906_v0 = vpack.c.bf16 %v905_v62, %v905_v62  ;;  %v1420_v1 = vpop.eup %1419 }
 0x4fb   :  { %1323 = vmatmul.mubr.msk.bf16.vlgmr.msra.gmra.mrb[24].mxu0 %vm198_vm4, %v788_v59  ;;  %v1023_v3 = vmul.f32 %v1420_v1, %v1630_v20 }
 0x4fc   :  { %1333 = vmatpush3.bf16.msra.mxu0 %v913_v61  ;;  %1334 = vmatprep.mubr.msk.bf16.mxu0 %vm1447_vm1, %v1446_v37 }
 0x4fd   :  { %1344 = vmatprep.subr.bf16.mxu0 %v1446_v37  ;;  %v1024_v4 = vpack.c.bf16 %v1023_v3, %v1023_v3 }
 0x503   :  { %1335 = vmatmul.mubr.msk.bf16.vlgmr.msra.gmra.mrb[28].mxu0 %vm198_vm4, %v906_v0 }
 0x504   :  { %1345 = vmatpush3.bf16.msra.mxu0 %v1031_v2  ;;  %1346 = vmatprep.mubr.msk.bf16.mxu0 %vm1447_vm1, %v1446_v37 }
 0x50b   :  { %1347 = vmatmul.mubr.msk.bf16.vlgmr.msra.gmra.mrb[32].mxu0 %vm198_vm4, %v1024_v4 }
 0x579   :  { %v252_v5 = vpop.f32.mrb[4].mxu0 }
 0x57a   :  { %v258_v6 = vpack.c.bf16 %v252_v5, %v252_v5  ;;  %v1264_v7 = vpop.f32.mrb[5].mxu0 }
 0x57b   :  { %v255_v8 = vpop.f32.mrb[6].mxu0 }
 0x57c   :  { %260 = vst.msk [vmem:[#allocation2] sm:$0xf] %vm259_vm5, %v258_v6  ;;  %v1265_v9 = vpop.f32.mrb[7].mxu0 }
 0x581   :  { %v366_v10 = vpop.f32.mrb[8].mxu0 }
 0x582   :  { %v372_v11 = vpack.c.bf16 %v366_v10, %v366_v10  ;;  %v1276_v12 = vpop.f32.mrb[9].mxu0 }
 0x583   :  { %v369_v13 = vpop.f32.mrb[10].mxu0 }
 0x584   :  { %374 = vrot.lane.b32.xlu1 %v372_v11, %s1454_s13  ;;  %v1277_v14 = vpop.f32.mrb[11].mxu0 }
 0x589   :  { %v483_v15 = vpop.f32.mrb[12].mxu0 }
 0x58a   :  { %v489_v16 = vpack.c.bf16 %v483_v15, %v483_v15  ;;  %v1288_v17 = vpop.f32.mrb[13].mxu0 }
 0x58b   :  { %v486_v18 = vpop.f32.mrb[14].mxu0 }
 0x58c   :  { %491 = vrot.lane.b32.xlu1 %v489_v16, %s1452_s11  ;;  %v1289_v19 = vpop.f32.mrb[15].mxu0 }
 0x592   :  { %v600_v43 = vpop.f32.mrb[16].mxu0 }
 0x593   :  { %v606_v20 = vpack.c.bf16 %v600_v43, %v600_v43  ;;  %v1300_v21 = vpop.f32.mrb[17].mxu0 }
 0x594   :  { %v603_v22 = vpop.f32.mrb[18].mxu0 }
 0x595   :  { %608 = vrot.lane.b32.xlu0 %v606_v20, %s1448_s1  ;;  %v1301_v23 = vpop.f32.mrb[19].mxu0 }
 0x59a   :  { %v715_v24 = vpop.f32.mrb[20].mxu0 }
 0x59b   :  { %v721_v25 = vpack.c.bf16 %v715_v24, %v715_v24  ;;  %v1312_v26 = vpop.f32.mrb[21].mxu0 }
 0x59c   :  { %v718_v27 = vpop.f32.mrb[22].mxu0 }
 0x59d   :  { %v723_v28 = vrot.slane %v721_v25, 4  ;;  %v1313_v29 = vpop.f32.mrb[23].mxu0 }
 0x59f   :  { %726 = vst.msk [vmem:[#allocation2] sm:$0xf0] %vm725_vm6, %v723_v28 }
 0x5ce   :  { %v831_v30 = vpop.f32.mrb[24].mxu0 }
 0x5cf   :  { %v837_v32 = vpack.c.bf16 %v831_v30, %v831_v30  ;;  %v1324_v33 = vpop.f32.mrb[25].mxu0 }
 0x5d0   :  { %v834_v34 = vpop.f32.mrb[26].mxu0 }
 0x5d1   :  { %v839_v36 = vrot.slane %v837_v32, 4  ;;  %v1325_v38 = vpop.f32.mrb[27].mxu0 }
 0x5d3   :  { %840 = vrot.lane.b32.xlu1 %v839_v36, %s1454_s13 }
 0x5d6   :  { %v949_v39 = vpop.f32.mrb[28].mxu0 }
 0x5d7   :  { %v955_v41 = vpack.c.bf16 %v949_v39, %v949_v39  ;;  %v1336_v42 = vpop.f32.mrb[29].mxu0 }
 0x5d8   :  { %v952_v44 = vpop.f32.mrb[30].mxu0 }
 0x5d9   :  { %v957_v46 = vrot.slane %v955_v41, 4  ;;  %v1337_v47 = vpop.f32.mrb[31].mxu0 }
 0x5db   :  { %958 = vrot.lane.b32.xlu1 %v957_v46, %s1452_s11 }
 0x5de   :  { %v1067_v48 = vpop.f32.mrb[32].mxu0 }
 0x5df   :  { %v1073_v49 = vpack.c.bf16 %v1067_v48, %v1067_v48  ;;  %v1348_v50 = vpop.f32.mrb[33].mxu0 }
 0x5e0   :  { %v1070_v51 = vpop.f32.mrb[34].mxu0 }
 0x5e1   :  { %v1075_v52 = vrot.slane %v1073_v49, 4  ;;  %v1349_v53 = vpop.f32.mrb[35].mxu0 }
 0x5e3   :  { %1076 = vrot.lane.b32.xlu1 %v1075_v52, %s1448_s1 }
 0x5f6   :  { %v375_v54 = vpop.permute.xlu1 %374 }
 0x5f7   :  { %378 = vst.msk [vmem:[#allocation2] sm:$0xf] %vm377_vm7, %v375_v54 }
 0x5fe   :  { %v492_v55 = vpop.permute.xlu1 %491 }
 0x5ff   :  { %495 = vst.msk [vmem:[#allocation2] sm:$0xf] %vm494_vm8, %v492_v55 }
 0x607   :  { %v609_v56 = vpop.permute.xlu0 %608 }
 0x608   :  { %612 = vst.msk [vmem:[#allocation2] sm:$0xf] %vm611_vm9, %v609_v56 }
 0x645   :  { %v841_v37 = vpop.permute.xlu1 %840 }
 0x646   :  { %844 = vst.msk [vmem:[#allocation2] sm:$0xf0] %vm843_vm10, %v841_v37 }
 0x64d   :  { %v959_v57 = vpop.permute.xlu1 %958 }
 0x64e   :  { %962 = vst.msk [vmem:[#allocation2] sm:$0xf0] %vm961_vm11, %v959_v57 }
 0x655   :  { %v1077_v58 = vpop.permute.xlu1 %1076 }
 0x656   :  { %1080 = vst.msk [vmem:[#allocation2] sm:$0xf0] %vm1079_vm12, %v1077_v58 }
 0x65d   :  { %v1081_v59 = vld [vmem:[#allocation2] sm:$0xff] }
 0x65e   :  { %1359 = vmatmul.mubr.msk.bf16.vlgmr.msra.gmra.mrb[32].mxu1 %vm1121_vm13, %v1081_v59 }
 0x731   :  { %v1159_v61 = vpop.f32.mrb[32].mxu1 }
 0x732   :  { %v1160_v62 = vadd.f32 %v1207_v60, %v1159_v61  ;;  %v1360_v63 = vpop.f32.mrb[33].mxu1 }
 0x733   :  { %v1162_v0 = vpop.f32.mrb[34].mxu1 }
 0x734   :  { %1166 = vst.msk [vmem:[#allocation3] sm:$0xff] %vm29_vm0, %v1160_v62  ;;  %v1163_v1 = vadd.f32 %v1207_v60, %v1162_v0  ;;  %v1361_v2 = vpop.f32.mrb[35].mxu1 }
 0x736   :  { %1167 = vst.msk [vmem:[#allocation3 + $0x8] sm:$0xff] %vm29_vm0, %v1163_v1 }
 0x737   :  { %1432 = shalt.err (!%p1429_p4)
}
 0x738   :  { %s1433_s26 = scalar_lea.hbm %s1725_s6, 256 }
 0x739   :  { %p1434_p5 = scmp.ne.s32.totalorder %s1725_s6, %s1433_s26  ;;  %p1437_p6 = scmp.lt.u32.totalorder %s1433_s26, %s1725_s6 }
 0x73b   :  { %p1439_p7 = pnand %p1437_p6, %p1434_p5 }
 0x73d   :  { %1442 = shalt.err (!%p1439_p7)
}
 0x73e   :  { %s1456_s7 = smov 128   ;;  %s1457_s3 = smov 8  }
 0x73f   :  { %1179 = dma.vmem_to_hbm [thread:$0]  %s1174_s23, 256, %s1725_s6, [#allocation4], %s1456_s7, %s1456_s7, %s1457_s3  }
 0x740   :  { %1443 = dma.done.wait [#allocation4], 256  }
 0x741   :  { %1444 = vsyncadd [#allocation4], 4294967040 }
 0x742   :  { %1183 = vsyncpa [#allocation4], 1 }

</bundles_post_ra>
